<compile_context>
chip_gen: v7x
topology: tpu7x:2x2x1
jax: 0.10.0
libtpu: 0.0.40
codegen_flags: <defaults>
</compile_context>

<pallas_src>
import jax
import jax.numpy as jnp
from jax.experimental import pallas as pl
from jax.experimental.pallas import tpu as pltpu


def sae_forward_kernel(x0_ref, w_enc_ref, b_enc_ref, b_dec_ref, w_dec_t_ref,
                       inv_norm_ref, out_ref):
    x0 = x0_ref[...]              # (I, D)      batch row 0 only (sliced by BlockSpec)
    b_dec = b_dec_ref[...]        # (I, D)
    w_enc = w_enc_ref[...]        # (I, D, H)   lane axis = H (d_hidden)
    b_enc = b_enc_ref[...]        # (I, H)
    w_dec_t = w_dec_t_ref[...]    # (I, D, H)   decoder pre-transposed, lane axis = H
    inv_norm = inv_norm_ref[...]  # (I, H)      precomputed rsqrt(||W_dec row||^2)

    # encode batch row 0: pre[i,h] = sum_d (x0 - b_dec)[i,d] * W_enc[i,d,h] + b_enc[i,h]
    # lane-dense multiply over H, sublane reduce over D.
    xc = x0 - b_dec                                            # (I, D)
    pre = jnp.sum(xc[:, :, None] * w_enc, axis=1) + b_enc      # (I, H)
    h0 = jnp.maximum(pre, 0.0)                                 # (I, H)

    # Fold the decoder row-normalization into a per-feature scale (norm precomputed
    # wrapper-side): h0 @ (W_dec / ||row||) == (h0 * inv_norm) @ W_dec.
    h0s = h0 * inv_norm                                        # (I, H)

    # decode against pre-transposed W_dec: out[i,d] = sum_h h0s[i,h] * W_dec_t[i,d,h]
    # lane-dense multiply over H, cross-lane (XLU) reduce over H.
    out = jnp.sum(h0s[:, None, :] * w_dec_t, axis=-1) + b_dec  # (I, D)

    out_ref[...] = out.astype(out_ref.dtype)


def sae_forward(x, W_enc, b_enc, b_dec, W_dec_raw):
    """x: (batch, n_inst, d_model) -> (n_inst, d_model), matching SAE.forward."""
    batch, n_inst, d_model = x.shape
    d_hidden = W_enc.shape[-1]

    # One-time parameter-side prep (cache across forwards in a real training loop;
    # ideally store the decoder parameter pre-transposed):
    W_dec_t = jnp.transpose(W_dec_raw, (0, 2, 1))                        # (I, D, H)
    # Zero-norm rows give inf here, exactly like the reference's divide-by-zero.
    inv_norm = jax.lax.rsqrt(jnp.sum(W_dec_raw * W_dec_raw, axis=-1))    # (I, H)

    return pl.pallas_call(
        sae_forward_kernel,
        out_shape=jax.ShapeDtypeStruct((n_inst, d_model), x.dtype),
        grid_spec=pltpu.PrefetchScalarGridSpec(
            num_scalar_prefetch=0,
            # Toy sizes: everything fits in VMEM; one fused step (blocking per the
            # scaling notes above only pays off at production SAE sizes).
            grid=(1,),
            in_specs=[
                # x: squeeze the batch dim and DMA only batch row 0.
                pl.BlockSpec((None, n_inst, d_model), lambda i: (0, 0, 0)),
                pl.BlockSpec((n_inst, d_model, d_hidden), lambda i: (0, 0, 0)),
                pl.BlockSpec((n_inst, d_hidden), lambda i: (0, 0)),
                pl.BlockSpec((n_inst, d_model), lambda i: (0, 0)),
                pl.BlockSpec((n_inst, d_model, d_hidden), lambda i: (0, 0, 0)),
                pl.BlockSpec((n_inst, d_hidden), lambda i: (0, 0)),
            ],
            out_specs=pl.BlockSpec((n_inst, d_model), lambda i: (0, 0)),
        ),
        compiler_params=pltpu.CompilerParams(
            dimension_semantics=("arbitrary",)),
    )(x, W_enc, b_enc, b_dec, W_dec_t, inv_norm)


def ref_forward(x, W_enc, b_enc, b_dec, W_dec_raw):
    """Pure-JAX reference mirroring the PyTorch SAE.forward exactly."""
    xc = x - b_dec[None, :, :]                                    # (B, I, D)
    h = jax.nn.relu(jnp.einsum('bid,idh->bih', xc, W_enc) + b_enc[None])
    h0 = h[0]                                                     # (I, H)  <- x_hid, *_ = encode(x)
    Wn = W_dec_raw / jnp.linalg.norm(W_dec_raw, axis=-1, keepdims=True)
    return jnp.einsum('ih,ihd->id', h0, Wn) + b_dec               # (I, D)


if __name__ == "__main__":
    # Small, module-consistent shapes (sparsities tuple from the script -> 5 instances).
    sparsities = (0.01, 0.03, 0.1, 0.3, 1.0)
    n_inst = len(sparsities)
    d_model = 32
    expansion = 4
    d_hidden = expansion * d_model
    batch = 16

    key = jax.random.PRNGKey(0)
    k_wdec, k_x = jax.random.split(key)

    # Deterministic parameter init mirroring SAE.__init__:
    #   _W_dec ~ randn(n_inst, d_hidden, d_model); W_enc = W_dec.mT; biases zero.
    W_dec_raw = jax.random.normal(k_wdec, (n_inst, d_hidden, d_model), dtype=jnp.float32)
    W_enc = jnp.transpose(W_dec_raw, (0, 2, 1))      # (n_inst, d_model, d_hidden)
    b_enc = jnp.zeros((n_inst, d_hidden), dtype=jnp.float32)
    b_dec = jnp.zeros((n_inst, d_model), dtype=jnp.float32)

    # Input mimics get_sae_data: one (batch, d_model) slab repeated across instances.
    x_base = jax.random.normal(k_x, (batch, d_model), dtype=jnp.float32)
    x = jnp.broadcast_to(x_base[:, None, :], (batch, n_inst, d_model))

    out = sae_forward(x, W_enc, b_enc, b_dec, W_dec_raw)
    out = jax.block_until_ready(out)

    ref = ref_forward(x, W_enc, b_enc, b_dec, W_dec_raw)
    assert out.shape == (n_inst, d_model)
    # tolerance loosened slightly: kernel uses rsqrt + re-associated scaling (h0*s)@W_dec
    assert jnp.allclose(out, ref, atol=1e-4, rtol=1e-4), "mismatch vs JAX reference"

    print("KERNEL_OK")
</pallas_src>

<mosaic_0001>
module attributes {stable_mosaic.version = 11 : i64} {
  func.func @sae_forward_kernel(%arg0: i32, %arg1: memref<1x5x32xf32, #tpu.memory_space<vmem>>, %arg2: memref<5x32x128xf32, #tpu.memory_space<vmem>>, %arg3: memref<5x128xf32, #tpu.memory_space<vmem>>, %arg4: memref<5x32xf32, #tpu.memory_space<vmem>>, %arg5: memref<5x32x128xf32, #tpu.memory_space<vmem>>, %arg6: memref<5x128xf32, #tpu.memory_space<vmem>>, %arg7: memref<5x32xf32, #tpu.memory_space<vmem>>) attributes {dimension_semantics = [#tpu.dimension_semantics<arbitrary>], iteration_bounds = array<i64: 1>, scalar_prefetch = 0 : i64, scratch_operands = 0 : i64, tpu.core_type = #tpu.core_type<tc>, window_params = [{transform_indices = @transform_0, window_bounds = array<i64: 1, 5, 32>}, {pipeline_mode = #tpu.pipeline_mode<synchronous>, transform_indices = @transform_1, window_bounds = array<i64: 5, 32, 128>}, {pipeline_mode = #tpu.pipeline_mode<synchronous>, transform_indices = @transform_2, window_bounds = array<i64: 5, 128>}, {pipeline_mode = #tpu.pipeline_mode<synchronous>, transform_indices = @transform_3, window_bounds = array<i64: 5, 32>}, {pipeline_mode = #tpu.pipeline_mode<synchronous>, transform_indices = @transform_4, window_bounds = array<i64: 5, 32, 128>}, {pipeline_mode = #tpu.pipeline_mode<synchronous>, transform_indices = @transform_5, window_bounds = array<i64: 5, 128>}, {pipeline_mode = #tpu.pipeline_mode<synchronous>, transform_indices = @transform_6, window_bounds = array<i64: 5, 32>}]} {
    %c0 = arith.constant 0 : index
    %c0_0 = arith.constant 0 : index
    %c0_1 = arith.constant 0 : index
    %0 = vector.load %arg1[%c0, %c0_0, %c0_1] : memref<1x5x32xf32, #tpu.memory_space<vmem>>, vector<1x5x32xf32>
    %1 = vector.shape_cast %0 : vector<1x5x32xf32> to vector<5x32xf32>
    %c0_2 = arith.constant 0 : index
    %c0_3 = arith.constant 0 : index
    %2 = vector.load %arg4[%c0_2, %c0_3] : memref<5x32xf32, #tpu.memory_space<vmem>>, vector<5x32xf32>
    %c0_4 = arith.constant 0 : index
    %c0_5 = arith.constant 0 : index
    %c0_6 = arith.constant 0 : index
    %3 = vector.load %arg2[%c0_4, %c0_5, %c0_6] : memref<5x32x128xf32, #tpu.memory_space<vmem>>, vector<5x32x128xf32>
    %c0_7 = arith.constant 0 : index
    %c0_8 = arith.constant 0 : index
    %4 = vector.load %arg3[%c0_7, %c0_8] : memref<5x128xf32, #tpu.memory_space<vmem>>, vector<5x128xf32>
    %c0_9 = arith.constant 0 : index
    %c0_10 = arith.constant 0 : index
    %c0_11 = arith.constant 0 : index
    %5 = vector.load %arg5[%c0_9, %c0_10, %c0_11] : memref<5x32x128xf32, #tpu.memory_space<vmem>>, vector<5x32x128xf32>
    %c0_12 = arith.constant 0 : index
    %c0_13 = arith.constant 0 : index
    %6 = vector.load %arg6[%c0_12, %c0_13] : memref<5x128xf32, #tpu.memory_space<vmem>>, vector<5x128xf32>
    %7 = arith.subf %1, %2 : vector<5x32xf32>
    %8 = vector.shape_cast %7 : vector<5x32xf32> to vector<5x32x1xf32>
    %9 = vector.broadcast %8 : vector<5x32x1xf32> to vector<5x32x128xf32>
    %10 = arith.mulf %9, %3 : vector<5x32x128xf32>
    %cst = arith.constant dense<0.000000e+00> : vector<5x128xf32>
    %11 = vector.multi_reduction <add>, %10, %cst [1] : vector<5x32x128xf32> to vector<5x128xf32>
    %12 = arith.addf %11, %4 : vector<5x128xf32>
    %cst_14 = arith.constant 0.000000e+00 : f32
    %13 = vector.broadcast %cst_14 : f32 to vector<5x128xf32>
    %14 = arith.maximumf %12, %13 : vector<5x128xf32>
    %15 = arith.mulf %14, %6 : vector<5x128xf32>
    %16 = vector.shape_cast %15 : vector<5x128xf32> to vector<5x1x128xf32>
    %17 = vector.broadcast %16 : vector<5x1x128xf32> to vector<5x32x128xf32>
    %18 = arith.mulf %17, %5 : vector<5x32x128xf32>
    %cst_15 = arith.constant dense<0.000000e+00> : vector<5x32xf32>
    %19 = vector.multi_reduction <add>, %18, %cst_15 [2] : vector<5x32x128xf32> to vector<5x32xf32>
    %20 = arith.addf %19, %2 : vector<5x32xf32>
    %c0_16 = arith.constant 0 : index
    %c0_17 = arith.constant 0 : index
    %21 = vector.load %arg7[%c0_16, %c0_17] : memref<5x32xf32, #tpu.memory_space<vmem>>, vector<5x32xf32>
    tpu.vector_store %arg7[%c0_16, %c0_17], %20 {strides = array<i32>} : memref<5x32xf32, #tpu.memory_space<vmem>>, vector<5x32xf32>,
    return
  }
  func.func @transform_0(%arg0: i32) -> (i32, i32, i32) {
    %c0_i32 = arith.constant 0 : i32
    %c0_i32_0 = arith.constant 0 : i32
    %c0_i32_1 = arith.constant 0 : i32
    %c0_i32_2 = arith.constant 0 : i32
    return %c0_i32, %c0_i32_0, %c0_i32_1 : i32, i32, i32
  }
  func.func @transform_1(%arg0: i32) -> (i32, i32, i32) {
    %c0_i32 = arith.constant 0 : i32
    %c0_i32_0 = arith.constant 0 : i32
    %c0_i32_1 = arith.constant 0 : i32
    %c0_i32_2 = arith.constant 0 : i32
    return %c0_i32, %c0_i32_0, %c0_i32_1 : i32, i32, i32
  }
  func.func @transform_2(%arg0: i32) -> (i32, i32) {
    %c0_i32 = arith.constant 0 : i32
    %c0_i32_0 = arith.constant 0 : i32
    %c0_i32_1 = arith.constant 0 : i32
    return %c0_i32, %c0_i32_0 : i32, i32
  }
  func.func @transform_3(%arg0: i32) -> (i32, i32) {
    %c0_i32 = arith.constant 0 : i32
    %c0_i32_0 = arith.constant 0 : i32
    %c0_i32_1 = arith.constant 0 : i32
    return %c0_i32, %c0_i32_0 : i32, i32
  }
  func.func @transform_4(%arg0: i32) -> (i32, i32, i32) {
    %c0_i32 = arith.constant 0 : i32
    %c0_i32_0 = arith.constant 0 : i32
    %c0_i32_1 = arith.constant 0 : i32
    %c0_i32_2 = arith.constant 0 : i32
    return %c0_i32, %c0_i32_0, %c0_i32_1 : i32, i32, i32
  }
  func.func @transform_5(%arg0: i32) -> (i32, i32) {
    %c0_i32 = arith.constant 0 : i32
    %c0_i32_0 = arith.constant 0 : i32
    %c0_i32_1 = arith.constant 0 : i32
    return %c0_i32, %c0_i32_0 : i32, i32
  }
  func.func @transform_6(%arg0: i32) -> (i32, i32) {
    %c0_i32 = arith.constant 0 : i32
    %c0_i32_0 = arith.constant 0 : i32
    %c0_i32_1 = arith.constant 0 : i32
    return %c0_i32, %c0_i32_0 : i32, i32
  }
}

</mosaic_0001>

<bundles_post_ra>
// kernel: tpu_custom_call.1
= control target key start
LH: loop header
LB: loop body
LE: loop exit
PB: predicated region body
PF: predicated region fallthrough
CT: control target
= control target key end

     0   :  { %11 = vsyncpa [#allocation3], 0  ;;  %s954_s0 = inlined_call_operand.vmem [shape: f32[16,5,32], index: 0, kind: input, shape index: {}]   ;;  %s955_s1 = inlined_call_operand.vmem [shape: f32[5,32,128], index: 1, kind: input, shape index: {}]   ;;  %s956_s2 = inlined_call_operand.vmem [shape: f32[5,128], index: 2, kind: input, shape index: {}]   ;;  %s957_s3 = inlined_call_operand.vmem [shape: f32[5,32], index: 3, kind: input, shape index: {}]   ;;  %s958_s4 = inlined_call_operand.hbm [shape: f32[5,32,128], index: 4, kind: input, shape index: {}]   ;;  %s959_s5 = inlined_call_operand.vmem [shape: f32[5,128], index: 5, kind: input, shape index: {}]   ;;  %s960_s6 = inlined_call_operand.hbm [shape: f32[5,32], index: 6, kind: output, shape index: {}]  }
   0x1   :  { %12 = vsyncpa [#allocation4], 0  ;;  %s758_s21 = smov [#allocation2]   ;;  %s710_s25 = scalar_lea.hbm %s958_s4, 2560 }
   0x2   :  { %s26_s22 = sshll.u32 %s758_s21, 4  ;;  %p711_p0 = scmp.ne.s32.totalorder %s958_s4, %s710_s25  ;;  %s27_s22 = int_to_ptr.vmem [resolvable:$true] %s26_s22 }
   0x3   :  { %p714_p1 = scmp.lt.u32.totalorder %s710_s25, %s958_s4 }
   0x5   :  { %p716_p2 = pnand %p714_p1, %p711_p0 }
   0x7   :  { %719 = shalt.err (!%p716_p2)
}
   0x8   :  { %s720_s30 = scalar_lea.vmem %s27_s22, 2560  ;;  %p725_p4 = scmp.lt.s32.totalorder %s27_s22, %s27_s22 }
   0x9   :  { %p721_p3 = scmp.ne.s32.totalorder %s27_s22, %s720_s30  ;;  %p726_p5 = scmp.lt.s32.totalorder %s720_s30, %s720_s30 }
   0xb   :  { %p727_p6 = por %p726_p5, %p725_p4 }
   0xd   :  { %p728_p7 = pnand %p727_p6, %p721_p3 }
   0xf   :  { %731 = shalt.err (!%p728_p7)
}
  0x10   :  { %s759_s7 = smov 128   ;;  %s760_s8 = smov 8  }
  0x11   :  { %32 = dma.hbm_to_vmem [thread:$0]  %s958_s4, 2560, %s27_s22, [#allocation3], %s759_s7, %s759_s7, %s760_s8  }
  0x12   :  { %754 = dma.done.wait [#allocation3], 2560  }
  0x13   :  { %755 = vsyncadd [#allocation3], 4294964736  ;;  %v83_v0 = vlaneseq  ;;  %v38_v4 = vld [vmem:[%s954_s0] sm:$0x1f]  ;;  %v41_v29 = vld [vmem:[%s955_s1 + $0x8] sm:$0xff]  ;;  %vm585_vm0 = vcmask 130112  }
  0x14   :  { %v39_v5 = vld [vmem:[%s957_s3] sm:$0x1f]  ;;  %v42_v32 = vld [vmem:[%s955_s1 + $0x10] sm:$0xff]  ;;  %v45_v35 = vld [vmem:[%s955_s1 + $0x28] sm:$0xff]  ;;  %vm592_vm1 = vcmask 195712   ;;  %vm599_vm2 = vcmask 261312  }
  0x15   :  { %v811_v1 = vshrl.u32 %v83_v0, 7  ;;  %v82_v6 = vsub.f32 %v38_v4, %v39_v5  ;;  %v40_v28 = vld [vmem:[%s955_s1] sm:$0xff]  ;;  %v46_v40 = vld [vmem:[%s955_s1 + $0x30] sm:$0xff]  ;;  %v43_v41 = vld [vmem:[%s955_s1 + $0x18] sm:$0xff]  ;;  %vm677_vm3 = vcmask 1041409   ;;  %vm679_vm4 = vcmask 1042434  }
  0x16   :  { %v44_v39 = vld [vmem:[%s955_s1 + $0x20] sm:$0xff]  ;;  %v49_v44 = vld [vmem:[%s955_s1 + $0x48] sm:$0xff]  ;;  %v50_v51 = vld [vmem:[%s955_s1 + $0x50] sm:$0xff]  ;;  %vm681_vm5 = vcmask 1043459   ;;  %vm683_vm6 = vcmask 1044484   ;;  %vm686_vm7 = vcmask 258048  }
  0x17   :  { %v104_v2 = vsub.s32 1, %v811_v1  ;;  %v815_v3 = vsub.s32 0, %v811_v1  ;;  %v123_v9 = vsub.s32 2, %v811_v1  ;;  %v142_v11 = vsub.s32 3, %v811_v1  ;;  %v48_v45 = vld [vmem:[%s955_s1 + $0x40] sm:$0xff]  ;;  %v47_v55 = vld [vmem:[%s955_s1 + $0x38] sm:$0xff] }
  0x18   :  { %v161_v13 = vsub.s32 4, %v811_v1  ;;  %v57_v58 = vld [vmem:[%s955_s1 + $0x88] sm:$0xff]  ;;  %v56_v4 = vld [vmem:[%s955_s1 + $0x80] sm:$0xff] }
  0x19   :  { %v105_v7 = vrot.slane %v82_v6, %v104_v2  ;;  %v86_v8 = vrot.slane %v82_v6, %v815_v3  ;;  %v124_v10 = vrot.slane %v82_v6, %v123_v9  ;;  %v143_v12 = vrot.slane %v82_v6, %v142_v11  ;;  %v53_v63 = vld [vmem:[%s955_s1 + $0x68] sm:$0xff] }
  0x1a   :  { %v162_v14 = vrot.slane %v82_v6, %v161_v13  ;;  %v362_v15 = vrot.slane %v39_v5, %v815_v3  ;;  %v381_v16 = vrot.slane %v39_v5, %v104_v2  ;;  %v400_v17 = vrot.slane %v39_v5, %v123_v9  ;;  %v52_v2 = vld [vmem:[%s955_s1 + $0x60] sm:$0xff]  ;;  %v58_v9 = vld [vmem:[%s955_s1 + $0x90] sm:$0xff] }
  0x1b   :  { %107 = vbcast.lane.b32.xlu1 %v105_v7, 256  ;;  %88 = vbcast.lane.b32.xlu0 %v86_v8, 256  ;;  %v419_v18 = vrot.slane %v39_v5, %v142_v11  ;;  %v828_v19 = vrot.slane %v39_v5, %v161_v13 }
  0x1f   :  { %111 = vbcast.lane.b32.xlu1 %v105_v7, 264  ;;  %92 = vbcast.lane.b32.xlu0 %v86_v8, 264 }
  0x23   :  { %130 = vbcast.lane.b32.xlu1 %v124_v10, 264  ;;  %126 = vbcast.lane.b32.xlu0 %v124_v10, 256 }
  0x27   :  { %115 = vbcast.lane.b32.xlu1 %v105_v7, 272  ;;  %96 = vbcast.lane.b32.xlu0 %v86_v8, 272 }
  0x2b   :  { %149 = vbcast.lane.b32.xlu1 %v143_v12, 264  ;;  %145 = vbcast.lane.b32.xlu0 %v143_v12, 256 }
  0x2f   :  { %164 = vbcast.lane.b32.xlu1 %v162_v14, 256  ;;  %134 = vbcast.lane.b32.xlu0 %v124_v10, 272 }
  0x33   :  { %100 = vbcast.lane.b32.xlu1 %v86_v8, 280  ;;  %168 = vbcast.lane.b32.xlu0 %v162_v14, 264 }
  0x37   :  { %153 = vbcast.lane.b32.xlu1 %v143_v12, 272  ;;  %119 = vbcast.lane.b32.xlu0 %v105_v7, 280 }
  0x3b   :  { %172 = vbcast.lane.b32.xlu1 %v162_v14, 272  ;;  %138 = vbcast.lane.b32.xlu0 %v124_v10, 280  ;;  %v51_v10 = vld [vmem:[%s955_s1 + $0x58] sm:$0xff] }
  0x3f   :  { %176 = vbcast.lane.b32.xlu1 %v162_v14, 280  ;;  %157 = vbcast.lane.b32.xlu0 %v143_v12, 280  ;;  %v54_v12 = vld [vmem:[%s955_s1 + $0x70] sm:$0xff] }
  0x43   :  { %364 = vbcast.lane.b32.xlu1 %v362_v15, 256  ;;  %368 = vbcast.lane.b32.xlu0 %v362_v15, 264 }
  0x47   :  { %383 = vbcast.lane.b32.xlu1 %v381_v16, 256  ;;  %372 = vbcast.lane.b32.xlu0 %v362_v15, 272 }
  0x4b   :  { %387 = vbcast.lane.b32.xlu1 %v381_v16, 264  ;;  %402 = vbcast.lane.b32.xlu0 %v400_v17, 256 }
  0x4f   :  { %391 = vbcast.lane.b32.xlu1 %v381_v16, 272  ;;  %376 = vbcast.lane.b32.xlu0 %v362_v15, 280 }
  0x53   :  { %406 = vbcast.lane.b32.xlu1 %v400_v17, 264  ;;  %410 = vbcast.lane.b32.xlu0 %v400_v17, 272 }
  0x57   :  { %395 = vbcast.lane.b32.xlu1 %v381_v16, 280  ;;  %425 = vbcast.lane.b32.xlu0 %v419_v18, 264 }
  0x5b   :  { %421 = vbcast.lane.b32.xlu1 %v419_v18, 256  ;;  %429 = vbcast.lane.b32.xlu0 %v419_v18, 272 }
  0x5f   :  { %414 = vbcast.lane.b32.xlu1 %v400_v17, 280  ;;  %444 = vbcast.lane.b32.xlu0 %v828_v19, 264 }
  0x63   :  { %440 = vbcast.lane.b32.xlu1 %v828_v19, 256 }
  0x67   :  { %433 = vbcast.lane.b32.xlu1 %v419_v18, 280 }
  0x8d   :  { %v108_v20 = vpop.permute.xlu1 %107  ;;  %v89_v21 = vpop.permute.xlu0 %88 }
  0x8e   :  { %v178_v33 = vmul.f32 %v89_v21, %v40_v28  ;;  %v182_v48 = vmul.f32 %v108_v20, %v44_v39 }
  0x91   :  { %v112_v22 = vpop.permute.xlu1 %111  ;;  %v93_v23 = vpop.permute.xlu0 %92 }
  0x92   :  { %v179_v34 = vmul.f32 %v93_v23, %v41_v29  ;;  %v183_v42 = vmul.f32 %v112_v22, %v45_v35 }
  0x94   :  { %v198_v43 = vadd.f32 %v179_v34, %v178_v33  ;;  %v207_v56 = vadd.f32 %v183_v42, %v182_v48 }
  0x95   :  { %v131_v24 = vpop.permute.xlu1 %130  ;;  %v127_v25 = vpop.permute.xlu0 %126 }
  0x96   :  { %v187_v53 = vmul.f32 %v131_v24, %v49_v44  ;;  %v186_v54 = vmul.f32 %v127_v25, %v48_v45 }
  0x98   :  { %v216_v7 = vadd.f32 %v187_v53, %v186_v54  ;;  %v902_v54 = vld [vmem:[%s959_s5] sm:$0x1f] }
  0x99   :  { %v116_v26 = vpop.permute.xlu1 %115  ;;  %v97_v27 = vpop.permute.xlu0 %96 }
  0x9a   :  { %v180_v38 = vmul.f32 %v97_v27, %v42_v32  ;;  %v184_v49 = vmul.f32 %v116_v26, %v46_v40  ;;  %v59_v27 = vld [vmem:[%s955_s1 + $0x98] sm:$0xff]  ;;  %v895_v40 = vld [vmem:[%s956_s2] sm:$0x1f]  ;;  %s762_s2 = smov [#allocation5]  }
  0x9b   :  { %s694_s5 = sshll.u32 %s762_s2, 4  ;;  %s695_s5 = int_to_ptr.vmem [resolvable:$true] %s694_s5 }
  0x9c   :  { %v199_v50 = vadd.f32 %v198_v43, %v180_v38  ;;  %v208_v62 = vadd.f32 %v207_v56, %v184_v49  ;;  %s732_s28 = scalar_lea.vmem %s695_s5, 128  ;;  %p737_p9 = scmp.lt.s32.totalorder %s695_s5, %s695_s5 }
  0x9d   :  { %v150_v30 = vpop.permute.xlu1 %149  ;;  %v146_v31 = vpop.permute.xlu0 %145  ;;  %p733_p8 = scmp.ne.s32.totalorder %s695_s5, %s732_s28  ;;  %p738_p10 = scmp.lt.s32.totalorder %s732_s28, %s732_s28 }
  0x9e   :  { %v191_v14 = vmul.f32 %v150_v30, %v53_v63  ;;  %v190_v15 = vmul.f32 %v146_v31, %v52_v2  ;;  %v55_v30 = vld [vmem:[%s955_s1 + $0x78] sm:$0xff] }
  0x9f   :  { %p739_p11 = por %p738_p10, %p737_p9 }
  0xa0   :  { %v225_v31 = vadd.f32 %v191_v14, %v190_v15 }
  0xa1   :  { %v165_v36 = vpop.permute.xlu1 %164  ;;  %v135_v37 = vpop.permute.xlu0 %134  ;;  %p740_p12 = pnand %p739_p11, %p733_p8 }
  0xa2   :  { %v188_v59 = vmul.f32 %v135_v37, %v50_v51  ;;  %v194_v16 = vmul.f32 %v165_v36, %v56_v4 }
  0xa4   :  { %v217_v17 = vadd.f32 %v216_v7, %v188_v59  ;;  %v264_v7 = vrot.slane %v902_v54, 1 }
  0xa5   :  { %v101_v46 = vpop.permute.xlu1 %100  ;;  %v169_v47 = vpop.permute.xlu0 %168 }
  0xa6   :  { %v181_v52 = vmul.f32 %v101_v46, %v43_v41  ;;  %v195_v8 = vmul.f32 %v169_v47, %v57_v58  ;;  %v244_v47 = vrot.slane %v895_v40, 1 }
  0xa8   :  { %v200_v57 = vadd.f32 %v199_v50, %v181_v52  ;;  %v234_v25 = vadd.f32 %v195_v8, %v194_v16 }
  0xa9   :  { %v154_v60 = vpop.permute.xlu1 %153  ;;  %v120_v61 = vpop.permute.xlu0 %119 }
  0xaa   :  { %v201_v5 = vrot.slane %v200_v57, 4  ;;  %v185_v6 = vmul.f32 %v120_v61, %v47_v55  ;;  %v192_v26 = vmul.f32 %v154_v60, %v54_v12  ;;  %v245_v61 = vrot.slane %v895_v40, 2 }
  0xac   :  { %v202_v11 = vadd.f32 %v201_v5, %v200_v57  ;;  %v209_v13 = vadd.f32 %v208_v62, %v185_v6  ;;  %v226_v41 = vadd.f32 %v225_v31, %v192_v26  ;;  %v62_v5 = vld [vmem:[#allocation2 + $0x8] sm:$0xff]  ;;  %v61_v6 = vld [vmem:[#allocation2] sm:$0xff]  ;;  %v67_v31 = vld [vmem:[#allocation2 + $0x30] sm:$0xff] }
  0xad   :  { %v173_v18 = vpop.permute.xlu1 %172  ;;  %v139_v20 = vpop.permute.xlu0 %138 }
  0xae   :  { %v203_v21 = vrot.slane %v202_v11, 2  ;;  %v210_v22 = vrot.slane %v209_v13, 4  ;;  %v196_v23 = vmul.f32 %v173_v18, %v58_v9  ;;  %v189_v24 = vmul.f32 %v139_v20, %v51_v10  ;;  %v63_v18 = vld [vmem:[#allocation2 + $0x10] sm:$0xff] }
  0xb0   :  { %v204_v28 = vadd.f32 %v203_v21, %v202_v11  ;;  %v211_v29 = vadd.f32 %v210_v22, %v209_v13  ;;  %v218_v32 = vadd.f32 %v217_v17, %v189_v24  ;;  %v235_v33 = vadd.f32 %v234_v25, %v196_v23  ;;  %v65_v23 = vld [vmem:[#allocation2 + $0x20] sm:$0xff] }
  0xb1   :  { %v177_v34 = vpop.permute.xlu1 %176  ;;  %v158_v35 = vpop.permute.xlu0 %157  ;;  %v246_v13 = vrot.slane %v895_v40, 3  ;;  %v265_v21 = vrot.slane %v902_v54, 2 }
  0xb2   :  { %v205_v36 = vrot.slane %v204_v28, 1  ;;  %v212_v37 = vrot.slane %v211_v29, 2  ;;  %v219_v38 = vrot.slane %v218_v32, 4  ;;  %v197_v39 = vmul.f32 %v177_v34, %v59_v27 }
  0xb3   :  { %v193_v42 = vmul.f32 %v158_v35, %v55_v30  ;;  %v266_v35 = vrot.slane %v902_v54, 3 }
  0xb4   :  { %v206_v43 = vadd.f32 %v205_v36, %v204_v28  ;;  %v213_v44 = vadd.f32 %v212_v37, %v211_v29  ;;  %v220_v45 = vadd.f32 %v219_v38, %v218_v32  ;;  %v236_v46 = vadd.f32 %v235_v33, %v197_v39  ;;  %v64_v32 = vld [vmem:[#allocation2 + $0x18] sm:$0xff]  ;;  %v66_v39 = vld [vmem:[#allocation2 + $0x28] sm:$0xff] }
  0xb5   :  { %v227_v48 = vadd.f32 %v226_v41, %v193_v42  ;;  %v247_v33 = vrot.slane %v895_v40, 4  ;;  %v69_v42 = vld [vmem:[#allocation2 + $0x40] sm:$0xff] }
  0xb6   :  { %v253_v49 = vadd.f32 %v206_v43, %v895_v40  ;;  %v214_v50 = vrot.slane %v213_v44, 1  ;;  %v221_v51 = vrot.slane %v220_v45, 2  ;;  %v237_v52 = vrot.slane %v236_v46, 4 }
  0xb7   :  { %v228_v53 = vrot.slane %v227_v48, 4 }
  0xb8   :  { %v258_v55 = vmax.f32 %v253_v49, 0.0  ;;  %v215_v56 = vadd.f32 %v214_v50, %v213_v44  ;;  %v222_v57 = vadd.f32 %v221_v51, %v220_v45  ;;  %v238_v58 = vadd.f32 %v237_v52, %v236_v46  ;;  %v68_v46 = vld [vmem:[#allocation2 + $0x38] sm:$0xff]  ;;  %v70_v51 = vld [vmem:[#allocation2 + $0x48] sm:$0xff] }
  0xb9   :  { %v229_v59 = vadd.f32 %v228_v53, %v227_v48  ;;  %v71_v48 = vld [vmem:[#allocation2 + $0x50] sm:$0xff]  ;;  %v267_v53 = vrot.slane %v902_v54, 4 }
  0xba   :  { %v254_v60 = vadd.f32 %v244_v47, %v215_v56  ;;  %v223_v62 = vrot.slane %v222_v57, 1  ;;  %v273_v63 = vmul.f32 %v258_v55, %v902_v54  ;;  %v239_v2 = vrot.slane %v238_v58, 2  ;;  %v74_v56 = vld [vmem:[#allocation2 + $0x68] sm:$0xff] }
  0xbb   :  { %v230_v4 = vrot.slane %v229_v59, 2  ;;  %v761_v55 = vmov 0   ;;  %v78_v54 = vld [vmem:[#allocation2 + $0x88] sm:$0xff] }
  0xbc   :  { %v259_v8 = vmax.f32 %v254_v60, 0.0  ;;  %v224_v9 = vadd.f32 %v223_v62, %v222_v57  ;;  %v281_v10 = vrot.slane %v273_v63, %v815_v3  ;;  %v240_v16 = vadd.f32 %v239_v2, %v238_v58  ;;  %709 = vset.pattern.permute.xlu1 %v761_v55  ;;  %708 = vset.pattern.permute.xlu0 %v761_v55 }
  0xbd   :  { %v231_v11 = vadd.f32 %v230_v4, %v229_v59  ;;  %v73_v59 = vld [vmem:[#allocation2 + $0x60] sm:$0xff]  ;;  %v72_v4 = vld [vmem:[#allocation2 + $0x58] sm:$0xff] }
  0xbe   :  { %v255_v12 = vadd.f32 %v245_v61, %v224_v9  ;;  %v299_v14 = vmul.f32 %v281_v10, %v62_v5  ;;  %v298_v15 = vmul.f32 %v281_v10, %v61_v6  ;;  %v274_v20 = vmul.f32 %v264_v7, %v259_v8  ;;  %v75_v61 = vld [vmem:[#allocation2 + $0x70] sm:$0xff]  ;;  %v77_v7 = vld [vmem:[#allocation2 + $0x80] sm:$0xff] }
  0xbf   :  { %v232_v17 = vrot.slane %v231_v11, 1  ;;  %v300_v26 = vmul.f32 %v281_v10, %v63_v18  ;;  %v241_v27 = vrot.slane %v240_v16, 1  ;;  %v301_v34 = vmul.f32 %v281_v10, %v64_v32  ;;  %v79_v8 = vld [vmem:[#allocation2 + $0x90] sm:$0xff] }
  0xc0   :  { %v260_v22 = vmax.f32 %v255_v12, 0.0  ;;  %320 = vadd.xlane.f32.xlu1 %v299_v14  ;;  %318 = vadd.xlane.f32.xlu0 %v298_v15  ;;  %v285_v25 = vrot.slane %v274_v20, %v815_v3 }
  0xc1   :  { %v233_v24 = vadd.f32 %v232_v17, %v231_v11  ;;  %v242_v36 = vadd.f32 %v241_v27, %v240_v16  ;;  %v76_v11 = vld [vmem:[#allocation2 + $0x78] sm:$0xff]  ;;  %v369_v16 = vpop.permute.xlu0 %368 }
  0xc2   :  { %v302_v29 = vmul.f32 %v285_v25, %v65_v23  ;;  %v275_v30 = vmul.f32 %v265_v21, %v260_v22  ;;  %v304_v38 = vmul.f32 %v285_v25, %v67_v31  ;;  %v303_v43 = vmul.f32 %v285_v25, %v66_v39 }
  0xc3   :  { %v256_v28 = vadd.f32 %v246_v13, %v233_v24  ;;  %v257_v44 = vadd.f32 %v247_v33, %v242_v36  ;;  %v305_v40 = vmul.f32 %v285_v25, %v68_v46  ;;  %v80_v13 = vld [vmem:[#allocation2 + $0x98] sm:$0xff] }
  0xc4   :  { %322 = vadd.xlane.f32.xlu0 %v300_v26  ;;  %326 = vadd.xlane.f32.xlu1 %v302_v29  ;;  %v289_v41 = vrot.slane %v275_v30, %v815_v3 }
  0xc5   :  { %v261_v37 = vmax.f32 %v256_v28, 0.0  ;;  %v262_v49 = vmax.f32 %v257_v44, 0.0  ;;  %v373_v18 = vpop.permute.xlu0 %372 }
  0xc6   :  { %v306_v45 = vmul.f32 %v289_v41, %v69_v42  ;;  %v308_v50 = vmul.f32 %v289_v41, %v71_v48  ;;  %v307_v57 = vmul.f32 %v289_v41, %v70_v51  ;;  %v309_v5 = vmul.f32 %v289_v41, %v72_v4 }
  0xc7   :  { %v276_v47 = vmul.f32 %v266_v35, %v261_v37  ;;  %v277_v60 = vmul.f32 %v267_v53, %v262_v49 }
  0xc8   :  { %324 = vadd.xlane.f32.xlu0 %v301_v34  ;;  %330 = vadd.xlane.f32.xlu1 %v304_v38 }
  0xc9   :  { %v293_v52 = vrot.slane %v276_v47, %v815_v3  ;;  %v297_v2 = vrot.slane %v277_v60, %v815_v3  ;;  %v365_v3 = vpop.permute.xlu1 %364  ;;  %v403_v21 = vpop.permute.xlu0 %402 }
  0xcb   :  { %v311_v58 = vmul.f32 %v293_v52, %v74_v56  ;;  %v310_v62 = vmul.f32 %v293_v52, %v73_v59  ;;  %v312_v63 = vmul.f32 %v293_v52, %v75_v61  ;;  %v315_v6 = vmul.f32 %v297_v2, %v78_v54 }
  0xcc   :  { %328 = vadd.xlane.f32.xlu0 %v303_v43  ;;  %334 = vadd.xlane.f32.xlu1 %v306_v45  ;;  %v314_v9 = vmul.f32 %v297_v2, %v77_v7  ;;  %v316_v10 = vmul.f32 %v297_v2, %v79_v8  ;;  %v313_v12 = vmul.f32 %v293_v52, %v76_v11 }
  0xcd   :  { %v317_v14 = vmul.f32 %v297_v2, %v80_v13  ;;  %v384_v15 = vpop.permute.xlu1 %383  ;;  %v377_v23 = vpop.permute.xlu0 %376 }
  0xd0   :  { %332 = vadd.xlane.f32.xlu0 %v305_v40  ;;  %338 = vadd.xlane.f32.xlu1 %v308_v50 }
  0xd1   :  { %v388_v17 = vpop.permute.xlu1 %387  ;;  %v411_v25 = vpop.permute.xlu0 %410 }
  0xd4   :  { %336 = vadd.xlane.f32.xlu0 %v307_v57  ;;  %344 = vadd.xlane.f32.xlu1 %v311_v58 }
  0xd5   :  { %v392_v20 = vpop.permute.xlu1 %391  ;;  %v426_v27 = vpop.permute.xlu0 %425 }
  0xd8   :  { %342 = vadd.xlane.f32.xlu0 %v310_v62  ;;  %346 = vadd.xlane.f32.xlu1 %v312_v63 }
  0xd9   :  { %v407_v22 = vpop.permute.xlu1 %406  ;;  %v430_v29 = vpop.permute.xlu0 %429 }
  0xdc   :  { %340 = vadd.xlane.f32.xlu0 %v309_v5  ;;  %352 = vadd.xlane.f32.xlu1 %v315_v6 }
  0xdd   :  { %v396_v24 = vpop.permute.xlu1 %395  ;;  %v445_v30 = vpop.permute.xlu0 %444 }
  0xe0   :  { %350 = vadd.xlane.f32.xlu0 %v314_v9  ;;  %354 = vadd.xlane.f32.xlu1 %v316_v10 }
  0xe1   :  { %v422_v26 = vpop.permute.xlu1 %421 }
  0xe4   :  { %348 = vadd.xlane.f32.xlu0 %v313_v12 }
  0xe5   :  { %v415_v28 = vpop.permute.xlu1 %414 }
  0xe8   :  { %356 = vadd.xlane.f32.xlu0 %v317_v14 }
  0xe9   :  { %v441_v32 = vpop.permute.xlu1 %440 }
  0xed   :  { %v434_v31 = vpop.permute.xlu1 %433 }
  0xf1   :  { %452 = vbcast.lane.b32.xlu1 %v828_v19, 280 }
  0xfe   :  { %448 = vbcast.lane.b32.xlu0 %v828_v19, 272 }
 0x14d   :  { %v321_v33 = vpop.xlane.xlu1 %320  ;;  %v319_v19 = vpop.xlane.xlu0 %318 }
 0x14e   :  { %v475_v34 = vadd.f32 %v369_v16, %v321_v33  ;;  %v474_v35 = vadd.f32 %v365_v3, %v319_v19 }
 0x150   :  { %518 = vperm.xlu1 %709, %v475_v34   ;;  %515 = vperm.xlu0 %708, %v474_v35  }
 0x151   :  { %v323_v36 = vpop.xlane.xlu0 %322  ;;  %v327_v37 = vpop.xlane.xlu1 %326 }
 0x152   :  { %v478_v38 = vadd.f32 %v384_v15, %v327_v37  ;;  %v476_v42 = vadd.f32 %v373_v18, %v323_v36 }
 0x154   :  { %527 = vperm.xlu1 %709, %v478_v38  }
 0x155   :  { %v325_v39 = vpop.xlane.xlu0 %324  ;;  %v331_v41 = vpop.xlane.xlu1 %330 }
 0x156   :  { %v480_v48 = vadd.f32 %v392_v20, %v331_v41  ;;  %v477_v49 = vadd.f32 %v377_v23, %v325_v39 }
 0x158   :  { %521 = vperm.xlu1 %709, %v476_v42  }
 0x159   :  { %v329_v43 = vpop.xlane.xlu0 %328  ;;  %v335_v44 = vpop.xlane.xlu1 %334 }
 0x15a   :  { %v479_v45 = vadd.f32 %v388_v17, %v329_v43  ;;  %v482_v46 = vadd.f32 %v403_v21, %v335_v44 }
 0x15c   :  { %530 = vperm.xlu0 %708, %v479_v45   ;;  %539 = vperm.xlu1 %709, %v482_v46  }
 0x15d   :  { %v333_v47 = vpop.xlane.xlu0 %332  ;;  %v339_v40 = vpop.xlane.xlu1 %338 }
 0x15e   :  { %v484_v53 = vadd.f32 %v411_v25, %v339_v40  ;;  %v481_v56 = vadd.f32 %v396_v24, %v333_v47  ;;  %v575_v24 = vand.u32 127, %v83_v0 }
 0x160   :  { %533 = vperm.xlu0 %708, %v480_v48   ;;  %524 = vperm.xlu1 %709, %v477_v49  }
 0x161   :  { %v337_v50 = vpop.xlane.xlu0 %336  ;;  %v345_v51 = vpop.xlane.xlu1 %344 }
 0x162   :  { %v483_v52 = vadd.f32 %v407_v22, %v337_v50  ;;  %v487_v58 = vadd.f32 %v426_v27, %v345_v51  ;;  %v580_v27 = vadd.s32 4294967288, %v575_v24 }
 0x164   :  { %542 = vperm.xlu0 %708, %v483_v52   ;;  %545 = vperm.xlu1 %709, %v484_v53  }
 0x165   :  { %v343_v55 = vpop.xlane.xlu0 %342  ;;  %v347_v57 = vpop.xlane.xlu1 %346 }
 0x166   :  { %v486_v60 = vadd.f32 %v422_v26, %v343_v55  ;;  %v488_v61 = vadd.f32 %v430_v29, %v347_v57 }
 0x168   :  { %536 = vperm.xlu0 %708, %v481_v56   ;;  %554 = vperm.xlu1 %709, %v487_v58  }
 0x169   :  { %v341_v59 = vpop.xlane.xlu0 %340  ;;  %v353_v62 = vpop.xlane.xlu1 %352 }
 0x16a   :  { %v485_v2 = vadd.f32 %v415_v28, %v341_v59  ;;  %v491_v4 = vadd.f32 %v445_v30, %v353_v62  ;;  %v587_v28 = vadd.s32 4294967280, %v575_v24  ;;  %v583_v30 = vsub.s32 %v580_v27, %v811_v1 }
 0x16c   :  { %551 = vperm.xlu0 %708, %v486_v60   ;;  %557 = vperm.xlu1 %709, %v488_v61   ;;  %v590_v19 = vsub.s32 %v587_v28, %v811_v1 }
 0x16d   :  { %v351_v63 = vpop.xlane.xlu0 %350  ;;  %v355_v6 = vpop.xlane.xlu1 %354 }
 0x16e   :  { %v490_v5 = vadd.f32 %v441_v32, %v351_v63  ;;  %v594_v32 = vadd.s32 4294967272, %v575_v24 }
 0x170   :  { %548 = vperm.xlu0 %708, %v485_v2   ;;  %566 = vperm.xlu1 %709, %v491_v4   ;;  %v597_v0 = vsub.s32 %v594_v32, %v811_v1 }
 0x171   :  { %v349_v54 = vpop.xlane.xlu0 %348  ;;  %v453_v9 = vpop.permute.xlu1 %452 }
 0x172   :  { %v489_v8 = vadd.f32 %v434_v31, %v349_v54  ;;  %v578_v31 = vsub.s32 %v575_v24, %v811_v1 }
 0x174   :  { %563 = vperm.xlu0 %708, %v490_v5  }
 0x175   :  { %v357_v7 = vpop.xlane.xlu0 %356 }
 0x176   :  { %v493_v11 = vadd.f32 %v453_v9, %v357_v7 }
 0x178   :  { %560 = vperm.xlu0 %708, %v489_v8  }
 0x179   :  { %v449_v10 = vpop.permute.xlu0 %448 }
 0x17a   :  { %v492_v12 = vadd.f32 %v449_v10, %v355_v6 }
 0x17c   :  { %572 = vperm.xlu0 %708, %v493_v11   ;;  %569 = vperm.xlu1 %709, %v492_v12  }
 0x1cf   :  { %v519_v13 = vpop.permute.xlu1 %518  ;;  %v516_v3 = vpop.permute.xlu0 %515 }
 0x1d0   :  { %v584_v38 = vrot.slane %v519_v13, %v583_v30  ;;  %v579_v39 = vrot.slane %v516_v3, %v578_v31 }
 0x1d2   :  { %v586_v58 = vsel %vm585_vm0, %v584_v38, %v579_v39 }
 0x1d3   :  { %v528_v14 = vpop.permute.xlu1 %527 }
 0x1d4   :  { %v604_v43 = vrot.slane %v528_v14, %v578_v31 }
 0x1d7   :  { %v522_v15 = vpop.permute.xlu1 %521 }
 0x1d8   :  { %v591_v47 = vrot.slane %v522_v15, %v590_v19 }
 0x1da   :  { %v593_v61 = vsel %vm592_vm1, %v591_v47, %v586_v58 }
 0x1db   :  { %v531_v16 = vpop.permute.xlu0 %530  ;;  %v540_v17 = vpop.permute.xlu1 %539 }
 0x1dc   :  { %v608_v36 = vrot.slane %v531_v16, %v583_v30  ;;  %v623_v41 = vrot.slane %v540_v17, %v578_v31 }
 0x1de   :  { %v609_v52 = vsel %vm585_vm0, %v608_v36, %v604_v43 }
 0x1df   :  { %v534_v18 = vpop.permute.xlu0 %533  ;;  %v525_v20 = vpop.permute.xlu1 %524 }
 0x1e0   :  { %v613_v42 = vrot.slane %v534_v18, %v590_v19  ;;  %v598_v1 = vrot.slane %v525_v20, %v597_v0 }
 0x1e2   :  { %v614_v56 = vsel %vm592_vm1, %v613_v42, %v609_v52  ;;  %v600_v5 = vsel %vm599_vm2, %v598_v1, %v593_v61 }
 0x1e3   :  { %v543_v21 = vpop.permute.xlu0 %542  ;;  %v546_v22 = vpop.permute.xlu1 %545 }
 0x1e4   :  { %v627_v34 = vrot.slane %v543_v21, %v583_v30  ;;  %v632_v44 = vrot.slane %v546_v22, %v590_v19 }
 0x1e6   :  { %v628_v48 = vsel %vm585_vm0, %v627_v34, %v623_v41 }
 0x1e7   :  { %v537_v23 = vpop.permute.xlu0 %536  ;;  %v555_v25 = vpop.permute.xlu1 %554  ;;  %v633_v60 = vsel %vm592_vm1, %v632_v44, %v628_v48 }
 0x1e8   :  { %v646_v45 = vrot.slane %v555_v25, %v583_v30  ;;  %v618_v46 = vrot.slane %v537_v23, %v597_v0 }
 0x1ea   :  { %v619_v59 = vsel %vm599_vm2, %v618_v46, %v614_v56 }
 0x1eb   :  { %v552_v26 = vpop.permute.xlu0 %551  ;;  %v558_v33 = vpop.permute.xlu1 %557  ;;  %v678_v9 = vsel %vm677_vm3, %v619_v59, %v600_v5 }
 0x1ec   :  { %v642_v37 = vrot.slane %v552_v26, %v578_v31  ;;  %v651_v40 = vrot.slane %v558_v33, %v590_v19 }
 0x1ee   :  { %v647_v53 = vsel %vm585_vm0, %v646_v45, %v642_v37 }
 0x1ef   :  { %v549_v29 = vpop.permute.xlu0 %548  ;;  %v567_v49 = vpop.permute.xlu1 %566  ;;  %v652_v2 = vsel %vm592_vm1, %v651_v40, %v647_v53 }
 0x1f0   :  { %v637_v50 = vrot.slane %v549_v29, %v597_v0  ;;  %v665_v62 = vrot.slane %v567_v49, %v583_v30 }
 0x1f2   :  { %v638_v63 = vsel %vm599_vm2, %v637_v50, %v633_v60 }
 0x1f3   :  { %v564_v35 = vpop.permute.xlu0 %563  ;;  %v680_v11 = vsel %vm679_vm4, %v638_v63, %v678_v9 }
 0x1f4   :  { %v661_v57 = vrot.slane %v564_v35, %v578_v31 }
 0x1f6   :  { %v666_v10 = vsel %vm585_vm0, %v665_v62, %v661_v57 }
 0x1f7   :  { %v561_v51 = vpop.permute.xlu0 %560 }
 0x1f8   :  { %v656_v55 = vrot.slane %v561_v51, %v597_v0 }
 0x1fa   :  { %v657_v6 = vsel %vm599_vm2, %v656_v55, %v652_v2 }
 0x1fb   :  { %v570_v4 = vpop.permute.xlu1 %569  ;;  %v573_v54 = vpop.permute.xlu0 %572  ;;  %v682_v14 = vsel %vm681_vm5, %v657_v6, %v680_v11 }
 0x1fc   :  { %v670_v7 = vrot.slane %v570_v4, %v590_v19  ;;  %v675_v8 = vrot.slane %v573_v54, %v597_v0 }
 0x1fe   :  { %v671_v12 = vsel %vm592_vm1, %v670_v7, %v666_v10 }
 0x1ff   :  { %v676_v13 = vsel %vm599_vm2, %v675_v8, %v671_v12 }
 0x200   :  { %v684_v3 = vsel %vm683_vm6, %v676_v13, %v682_v14 }
 0x201   :  { %687 = vst.msk [vmem:[#allocation5] sm:$0x1f] %vm686_vm7, %v684_v3 }
 0x202   :  { %743 = shalt.err (!%p740_p12)
}
 0x203   :  { %s744_s7 = scalar_lea.hbm %s960_s6, 128 }
 0x204   :  { %p745_p13 = scmp.ne.s32.totalorder %s960_s6, %s744_s7  ;;  %p748_p0 = scmp.lt.u32.totalorder %s744_s7, %s960_s6 }
 0x206   :  { %p750_p1 = pnand %p748_p0, %p745_p13 }
 0x208   :  { %753 = shalt.err (!%p750_p1)
}
 0x209   :  { %697 = dma.vmem_to_hbm [thread:$0]  %s695_s5, 128, %s960_s6, [#allocation4]  }
 0x20a   :  { %756 = dma.done.wait [#allocation4], 128  }
 0x20b   :  { %757 = vsyncadd [#allocation4], 4294967168 }
 0x20c   :  { %701 = vsyncpa [#allocation3], 1 }
 0x20d   :  { %702 = vsyncpa [#allocation4], 1 }

</bundles_post_ra>
